<compile_context>
chip_gen: v7x
topology: tpu7x:2x2x1
jax: 0.10.0
libtpu: 0.0.40
codegen_flags: <defaults>
</compile_context>

<pallas_src>
import jax
import jax.numpy as jnp
from jax.experimental import pallas as pl
from jax.experimental.pallas import tpu as pltpu


def cnn_kernel(x_ref, w1_ref, b1_ref, w2_ref, b2_ref, w3_ref, b3_ref, o_ref):
    """One batch tile. All intermediates are (hidden, TB): batch on lanes."""
    cdt = w1_ref.dtype  # MXU operand dtype (f32, or bf16 if use_bf16)
    # layer1 (conv already folded in): (h1, in) x (TB, in)^T -> (h1, TB)
    h = jax.lax.dot_general(
        w1_ref[...], x_ref[...],
        dimension_numbers=(((1,), (1,)), ((), ())),
        preferred_element_type=jnp.float32)
    h = jnp.tanh(h + b1_ref[...])                          # (h1, TB), f32
    # layer2: (h2, h1) @ (h1, TB) -> (h2, TB)
    h = jnp.dot(w2_ref[...], h.astype(cdt),
                preferred_element_type=jnp.float32)
    h = jnp.tanh(h + b2_ref[...])                          # (h2, TB), f32
    # output layer: (1, h2) @ (h2, TB) -> (1, TB); lane-dense store
    y = jnp.dot(w3_ref[...], h.astype(cdt),
                preferred_element_type=jnp.float32)
    o_ref[...] = (y + b3_ref[...]).astype(o_ref.dtype)


def _round_up(a, b):
    return ((a + b - 1) // b) * b


def conv_to_toeplitz(conv_w, conv_b, in_size):
    """Dense (in_size, C*L) matrix equivalent of Conv1d(1->C, K) + flatten
    (PyTorch channel-major flatten order c*L + t)."""
    C, K = conv_w.shape
    L = in_size - K + 1
    # Wc[i, c*L + t] = conv_w[c, i - t] for 0 <= i - t < K else 0
    k = jnp.arange(in_size)[:, None] - jnp.arange(L)[None, :]   # (in_size, L)
    valid = ((k >= 0) & (k < K)).astype(conv_w.dtype)
    kc = jnp.clip(k, 0, K - 1)
    wc = conv_w[:, kc] * valid[None, :, :]                      # (C, in_size, L)
    wc = jnp.transpose(wc, (1, 0, 2)).reshape(in_size, C * L)   # (in_size, C*L)
    bc = jnp.repeat(conv_b, L)[None, :]                         # (1, C*L)
    return wc, bc


def _choose_batch_tiling(B, block_b):
    """Pick (tile, padded_batch).  Single tile for small B; otherwise >= 2
    128-lane-aligned tiles so v7x's two TensorCores both get work."""
    b8 = _round_up(B, 8)
    if b8 <= 1024:
        return b8, b8
    n_tiles = max(2, pl.cdiv(b8, block_b))
    tb = _round_up(pl.cdiv(b8, n_tiles), 128)
    return tb, n_tiles * tb


def cnn_forward(x, params, *, block_b=8192, use_bf16=False):
    """x: (B, in_size) f32. Returns (B, 1) f32 matching the PyTorch CNN.forward."""
    B, in_size = x.shape
    hp = jax.lax.Precision.HIGHEST

    # --- Fuse conv(Toeplitz)+flatten into layer1 (no nonlinearity between). ---
    wc, bc = conv_to_toeplitz(params["conv_w"], params["conv_b"], in_size)
    w1f = jnp.dot(wc, params["w1"], precision=hp)                  # (in_size, h1)
    b1f = jnp.dot(bc, params["w1"], precision=hp) + params["b1"]   # (1, h1)

    # --- Batch-on-lanes weight/bias layouts for the kernel. ---
    w1t = w1f.T                                    # (h1, in_size)
    b1c = b1f.T                                    # (h1, 1)   f32
    w2t = params["w2"].T                           # (h2, h1)
    b2c = params["b2"].T                           # (h2, 1)   f32
    w3r = params["w3"].T                           # (1, h2)
    b3 = params["b3"].reshape(1, 1)                # (1, 1)    f32

    mxu_dtype = jnp.bfloat16 if use_bf16 else jnp.float32
    x_in = x.astype(mxu_dtype)
    w1t, w2t, w3r = (w.astype(mxu_dtype) for w in (w1t, w2t, w3r))

    tb, b_pad = _choose_batch_tiling(B, block_b)
    if b_pad != B:
        x_in = jnp.pad(x_in, ((0, b_pad - B), (0, 0)))
    grid = (pl.cdiv(b_pad, tb),)

    resident = lambda a: pl.BlockSpec(a.shape, lambda i: (0, 0))  # stays in VMEM

    # VMEM budget from actual buffers: double-buffered x tiles + output rows,
    # resident weights, plus headroom for the (hidden, TB) f32 intermediates.
    itemsize = jnp.dtype(mxu_dtype).itemsize
    h_max = max(w1t.shape[0], w2t.shape[0])
    weight_bytes = sum(int(a.size) * a.dtype.itemsize
                       for a in (w1t, b1c, w2t, b2c, w3r, b3))
    vmem_limit = int(2 * tb * in_size * itemsize      # x tiles (double-buffered)
                     + 2 * 8 * tb * 4                 # (1, tb) out tiles (padded)
                     + 4 * h_max * tb * 4             # live intermediates
                     + weight_bytes) + (4 << 20)
    vmem_limit = max(8 << 20, min(vmem_limit, 64 << 20))

    out = pl.pallas_call(
        cnn_kernel,
        out_shape=jax.ShapeDtypeStruct((1, b_pad), jnp.float32),
        grid=grid,
        in_specs=[
            pl.BlockSpec((tb, in_size), lambda i: (i, 0)),   # x: batch-tiled
            resident(w1t), resident(b1c),
            resident(w2t), resident(b2c),
            resident(w3r), resident(b3),
        ],
        out_specs=pl.BlockSpec((1, tb), lambda i: (0, i)),   # lane-dense row
        compiler_params=pltpu.CompilerParams(
            dimension_semantics=("parallel",),
            vmem_limit_bytes=vmem_limit,
        ),
    )(x_in, w1t, b1c, w2t, b2c, w3r, b3)

    return out.T[:B]   # (B, 1)


def init_cnn_params(key, in_size, kernel_size, h1, h2, n_channels=16):
    """PyTorch-default-style init; linear weights stored transposed as (in, out)."""
    L = in_size - kernel_size + 1
    flat = n_channels * L   # == (in_size - 2) * n_conv for kernel=3, n_conv=16
    params = {}
    key, kw, kb = jax.random.split(key, 3)
    bound = float(kernel_size) ** -0.5      # Conv1d fan_in = 1 * kernel_size
    params["conv_w"] = jax.random.uniform(kw, (n_channels, kernel_size),
                                          jnp.float32, -bound, bound)
    params["conv_b"] = jax.random.uniform(kb, (n_channels,), jnp.float32,
                                          -bound, bound)
    dims = [(flat, h1), (h1, h2), (h2, 1)]
    for i, (fan_in, fan_out) in enumerate(dims, start=1):
        key, kw, kb = jax.random.split(key, 3)
        bound = float(fan_in) ** -0.5
        params[f"w{i}"] = jax.random.uniform(kw, (fan_in, fan_out), jnp.float32,
                                             -bound, bound)
        params[f"b{i}"] = jax.random.uniform(kb, (1, fan_out), jnp.float32,
                                             -bound, bound)
    return params


def cnn_reference(x, params):
    """Pure-JAX reference of the PyTorch forward (conv -> flatten -> MLP)."""
    hp = jax.lax.Precision.HIGHEST
    C, K = params["conv_w"].shape
    B, n = x.shape
    L = n - K + 1
    patches = jnp.stack([x[:, k:k + L] for k in range(K)], axis=-1)   # (B, L, K)
    h = jnp.einsum("blk,ck->bcl", patches, params["conv_w"], precision=hp)
    h = h + params["conv_b"][None, :, None]
    h = h.reshape(B, C * L)                                           # PyTorch .view order
    h = jnp.tanh(jnp.dot(h, params["w1"], precision=hp) + params["b1"])
    h = jnp.tanh(jnp.dot(h, params["w2"], precision=hp) + params["b2"])
    return jnp.dot(h, params["w3"], precision=hp) + params["b3"]


if __name__ == "__main__":
    # CNN(in_size=16, n_conv=16, kernel=3, h1=32, h2=32)
    in_size, kernel_size, h1, h2 = 16, 3, 32, 32
    batch = 8

    key = jax.random.PRNGKey(0)
    key, kx = jax.random.split(key)
    x = jax.random.normal(kx, (batch, in_size), jnp.float32)
    params = init_cnn_params(key, in_size, kernel_size, h1, h2)

    out = jax.block_until_ready(cnn_forward(x, params))
    ref = cnn_reference(x, params)

    assert out.shape == (batch, 1), out.shape
    assert jnp.allclose(out, ref, atol=1e-5, rtol=1e-5), "mismatch vs reference"

    print("KERNEL_OK")
</pallas_src>

<mosaic_0001>
module attributes {stable_mosaic.version = 11 : i64} {
  func.func @cnn_kernel(%arg0: i32, %arg1: memref<8x16xf32, #tpu.memory_space<vmem>>, %arg2: memref<32x16xf32, #tpu.memory_space<vmem>>, %arg3: memref<32x1xf32, #tpu.memory_space<vmem>>, %arg4: memref<32x32xf32, #tpu.memory_space<vmem>>, %arg5: memref<32x1xf32, #tpu.memory_space<vmem>>, %arg6: memref<1x32xf32, #tpu.memory_space<vmem>>, %arg7: memref<1x1xf32, #tpu.memory_space<vmem>>, %arg8: memref<1x8xf32, #tpu.memory_space<vmem>>) attributes {dimension_semantics = [#tpu.dimension_semantics<parallel>], iteration_bounds = array<i64: 1>, scalar_prefetch = 0 : i64, scratch_operands = 0 : i64, tpu.core_type = #tpu.core_type<tc>, window_params = [{transform_indices = @transform_0, window_bounds = array<i64: 8, 16>}, {pipeline_mode = #tpu.pipeline_mode<synchronous>, transform_indices = @transform_1, window_bounds = array<i64: 32, 16>}, {pipeline_mode = #tpu.pipeline_mode<synchronous>, transform_indices = @transform_2, window_bounds = array<i64: 32, 1>}, {pipeline_mode = #tpu.pipeline_mode<synchronous>, transform_indices = @transform_3, window_bounds = array<i64: 32, 32>}, {pipeline_mode = #tpu.pipeline_mode<synchronous>, transform_indices = @transform_4, window_bounds = array<i64: 32, 1>}, {pipeline_mode = #tpu.pipeline_mode<synchronous>, transform_indices = @transform_5, window_bounds = array<i64: 1, 32>}, {pipeline_mode = #tpu.pipeline_mode<synchronous>, transform_indices = @transform_6, window_bounds = array<i64: 1, 1>}, {transform_indices = @transform_7, window_bounds = array<i64: 1, 8>}]} {
    %c0 = arith.constant 0 : index
    %c0_0 = arith.constant 0 : index
    %0 = vector.load %arg2[%c0, %c0_0] : memref<32x16xf32, #tpu.memory_space<vmem>>, vector<32x16xf32>
    %c0_1 = arith.constant 0 : index
    %c0_2 = arith.constant 0 : index
    %1 = vector.load %arg1[%c0_1, %c0_2] : memref<8x16xf32, #tpu.memory_space<vmem>>, vector<8x16xf32>
    %cst = arith.constant dense<0.000000e+00> : vector<32x8xf32>
    %2 = tpu.matmul %0, %1, %cst {dimension_numbers = #tpu.dot_dimension_numbers<[1], [1], [0], [0], [0, 0, 1, 0], [], []>} : vector<32x16xf32>, vector<8x16xf32>, vector<32x8xf32> -> vector<32x8xf32>
    %c0_3 = arith.constant 0 : index
    %c0_4 = arith.constant 0 : index
    %3 = vector.load %arg3[%c0_3, %c0_4] : memref<32x1xf32, #tpu.memory_space<vmem>>, vector<32x1xf32>
    %4 = vector.broadcast %3 : vector<32x1xf32> to vector<32x8xf32>
    %5 = arith.addf %2, %4 : vector<32x8xf32>
    %6 = math.tanh %5 : vector<32x8xf32>
    %c0_5 = arith.constant 0 : index
    %c0_6 = arith.constant 0 : index
    %7 = vector.load %arg4[%c0_5, %c0_6] : memref<32x32xf32, #tpu.memory_space<vmem>>, vector<32x32xf32>
    %cst_7 = arith.constant dense<0.000000e+00> : vector<32x8xf32>
    %8 = tpu.matmul %7, %6, %cst_7 {dimension_numbers = #tpu.dot_dimension_numbers<[1], [0], [0], [1], [0, 0, 1, 1], [], []>} : vector<32x32xf32>, vector<32x8xf32>, vector<32x8xf32> -> vector<32x8xf32>
    %c0_8 = arith.constant 0 : index
    %c0_9 = arith.constant 0 : index
    %9 = vector.load %arg5[%c0_8, %c0_9] : memref<32x1xf32, #tpu.memory_space<vmem>>, vector<32x1xf32>
    %10 = vector.broadcast %9 : vector<32x1xf32> to vector<32x8xf32>
    %11 = arith.addf %8, %10 : vector<32x8xf32>
    %12 = math.tanh %11 : vector<32x8xf32>
    %c0_10 = arith.constant 0 : index
    %c0_11 = arith.constant 0 : index
    %13 = vector.load %arg6[%c0_10, %c0_11] : memref<1x32xf32, #tpu.memory_space<vmem>>, vector<1x32xf32>
    %cst_12 = arith.constant dense<0.000000e+00> : vector<1x8xf32>
    %14 = tpu.matmul %13, %12, %cst_12 {dimension_numbers = #tpu.dot_dimension_numbers<[1], [0], [0], [1], [0, 0, 1, 1], [], []>} : vector<1x32xf32>, vector<32x8xf32>, vector<1x8xf32> -> vector<1x8xf32>
    %c0_13 = arith.constant 0 : index
    %c0_14 = arith.constant 0 : index
    %15 = vector.load %arg7[%c0_13, %c0_14] : memref<1x1xf32, #tpu.memory_space<vmem>>, vector<1x1xf32>
    %16 = vector.broadcast %15 : vector<1x1xf32> to vector<1x8xf32>
    %17 = arith.addf %14, %16 : vector<1x8xf32>
    %c0_15 = arith.constant 0 : index
    %c0_16 = arith.constant 0 : index
    %18 = vector.load %arg8[%c0_15, %c0_16] : memref<1x8xf32, #tpu.memory_space<vmem>>, vector<1x8xf32>
    tpu.vector_store %arg8[%c0_15, %c0_16], %17 {strides = array<i32>} : memref<1x8xf32, #tpu.memory_space<vmem>>, vector<1x8xf32>,
    return
  }
  func.func @transform_0(%arg0: i32) -> (i32, i32) {
    %c0_i32 = arith.constant 0 : i32
    %c0_i32_0 = arith.constant 0 : i32
    return %arg0, %c0_i32 : i32, i32
  }
  func.func @transform_1(%arg0: i32) -> (i32, i32) {
    %c0_i32 = arith.constant 0 : i32
    %c0_i32_0 = arith.constant 0 : i32
    %c0_i32_1 = arith.constant 0 : i32
    return %c0_i32, %c0_i32_0 : i32, i32
  }
  func.func @transform_2(%arg0: i32) -> (i32, i32) {
    %c0_i32 = arith.constant 0 : i32
    %c0_i32_0 = arith.constant 0 : i32
    %c0_i32_1 = arith.constant 0 : i32
    return %c0_i32, %c0_i32_0 : i32, i32
  }
  func.func @transform_3(%arg0: i32) -> (i32, i32) {
    %c0_i32 = arith.constant 0 : i32
    %c0_i32_0 = arith.constant 0 : i32
    %c0_i32_1 = arith.constant 0 : i32
    return %c0_i32, %c0_i32_0 : i32, i32
  }
  func.func @transform_4(%arg0: i32) -> (i32, i32) {
    %c0_i32 = arith.constant 0 : i32
    %c0_i32_0 = arith.constant 0 : i32
    %c0_i32_1 = arith.constant 0 : i32
    return %c0_i32, %c0_i32_0 : i32, i32
  }
  func.func @transform_5(%arg0: i32) -> (i32, i32) {
    %c0_i32 = arith.constant 0 : i32
    %c0_i32_0 = arith.constant 0 : i32
    %c0_i32_1 = arith.constant 0 : i32
    return %c0_i32, %c0_i32_0 : i32, i32
  }
  func.func @transform_6(%arg0: i32) -> (i32, i32) {
    %c0_i32 = arith.constant 0 : i32
    %c0_i32_0 = arith.constant 0 : i32
    %c0_i32_1 = arith.constant 0 : i32
    return %c0_i32, %c0_i32_0 : i32, i32
  }
  func.func @transform_7(%arg0: i32) -> (i32, i32) {
    %c0_i32 = arith.constant 0 : i32
    %c0_i32_0 = arith.constant 0 : i32
    return %c0_i32, %arg0 : i32, i32
  }
}

</mosaic_0001>

<bundles_post_ra>
// kernel: tpu_custom_call.1
= control target key start
LH: loop header
LB: loop body
LE: loop exit
PB: predicated region body
PF: predicated region fallthrough
CT: control target
= control target key end

     0   :  { %s640_s0 = inlined_call_operand.vmem [shape: f32[8,16], index: 0, kind: input, shape index: {}]   ;;  %s641_s1 = inlined_call_operand.vmem [shape: f32[32,16], index: 1, kind: input, shape index: {}]   ;;  %s642_s2 = inlined_call_operand.vmem [shape: f32[32,1], index: 2, kind: input, shape index: {}]   ;;  %s643_s3 = inlined_call_operand.vmem [shape: f32[32,32], index: 3, kind: input, shape index: {}]   ;;  %s644_s4 = inlined_call_operand.vmem [shape: f32[32,1], index: 4, kind: input, shape index: {}]   ;;  %s645_s5 = inlined_call_operand.vmem [shape: f32[1,32], index: 5, kind: input, shape index: {}]   ;;  %s646_s6 = inlined_call_operand.<no memory space> [shape: f32[1,1], index: 6, kind: input, shape index: {}]   ;;  %s647_s7 = inlined_call_operand.hbm [shape: f32[1,8], index: 7, kind: output, shape index: {}]  }
   0x1   :  { %v12_v0 = vstv %s646_s6 }
   0x2   :  { %13 = vst [vmem:[#allocation2] sm:$0x1] %v12_v0 }
   0x3   :  { %v33_v1 = vld [vmem:[%s640_s0] sm:$0xff]  ;;  %vm58_vm0 = vcmask 130048   ;;  %v30_v4 = vld [vmem:[%s641_s1 + $0x8] sm:$0xff]  ;;  %v515_v5 = vmov 0   ;;  %v36_v6 = vld [vmem:[%s642_s2 + $0x10] sm:$0xff] }
   0x4   :  { %v29_v2 = vld [vmem:[%s641_s1] sm:$0xff]  ;;  %421 = vmatprep.subr.msk.mxu0 %vm58_vm0, %v33_v1  ;;  %473 = vset.pattern.permute.xlu0 %v515_v5  ;;  %v31_v7 = vld [vmem:[%s641_s1 + $0x10] sm:$0xff]  ;;  %v35_v8 = vld [vmem:[%s642_s2 + $0x8] sm:$0xff] }
   0x5   :  { %423 = vmatprep.mubr.msk.f32.mxu0 %vm58_vm0, %v29_v2  ;;  %v34_v3 = vld [vmem:[%s642_s2] sm:$0xff]  ;;  %422 = vmatpush3.xpose.msk.msra.mxu0 %vm58_vm0, %v33_v1 }
   0x6   :  { %40 = vperm.xlu0 %473, %v34_v3   ;;  %474 = vset.pattern.permute.xlu1 %v515_v5 }
   0x7   :  { %50 = vperm.xlu1 %474, %v36_v6  }
   0x8   :  { %14 = vsyncpa [#allocation4], 0  ;;  %424 = vmatmul.mubr.msk.f32.vlgmr.msra.gmra.mrb[0].mxu0 %vm58_vm0, %v30_v4  ;;  %v37_v9 = vld [vmem:[%s642_s2 + $0x18] sm:$0xff]  ;;  %v167_v11 = vld [vmem:[%s644_s4] sm:$0xff]  ;;  %vm191_vm1 = vcmask 261120   ;;  %v516_v38 = vmov 0.0|0.0   ;;  %v300_v59 = vlaneseq }
   0x9   :  { %426 = vmatprep.mubr.msk.f32.mxu0 %vm58_vm0, %v31_v7  ;;  %v32_v10 = vld [vmem:[%s641_s1 + $0x18] sm:$0xff]  ;;  %v168_v12 = vld [vmem:[%s644_s4 + $0x8] sm:$0xff]  ;;  %v169_v13 = vld [vmem:[%s644_s4 + $0x10] sm:$0xff]  ;;  %462 = vmatprep.subr.bf16.mxu0 %v516_v38  ;;  %vm517_vm2 = vmmov 0   ;;  %v518_v39 = vmov 0.0   ;;  %s519_s9 = smov [#allocation3]  }
   0xa   :  { %45 = vperm.xlu0 %473, %v35_v8   ;;  %v170_v14 = vld [vmem:[%s644_s4 + $0x18] sm:$0xff]  ;;  %v294_v15 = vld [vmem:[#allocation2] sm:$0x1]  ;;  %v164_v35 = vld [vmem:[%s643_s3 + $0x8] sm:$0xff]  ;;  %v301_v60 = vshrl.u32 %v300_v59, 7  ;;  %s385_s0 = sshll.u32 %s519_s9, 4  ;;  %s386_s0 = int_to_ptr.vmem [resolvable:$true] %s385_s0 }
   0xb   :  { %55 = vperm.xlu1 %474, %v37_v9   ;;  %v163_v16 = vld [vmem:[%s643_s3] sm:$0xff]  ;;  %v165_v36 = vld [vmem:[%s643_s3 + $0x10] sm:$0xff]  ;;  %v166_v37 = vld [vmem:[%s643_s3 + $0x18] sm:$0xff]  ;;  %vm377_vm3 = vcmask 57344   ;;  %s491_s10 = scalar_lea.vmem %s386_s0, 16  ;;  %s495_s11 = scalar_lea.vmem %s386_s0, 32 }
   0xc   :  { %427 = vmatmul.mubr.msk.f32.gmra.mrb[2].mxu0 %vm58_vm0, %v32_v10  ;;  %437 = vmatprep.mubr.msk.f32.mxu1 %vm191_vm1, %v163_v16  ;;  %v293_v58 = vld [vmem:[%s645_s5] sm:$0x1]  ;;  %v302_v61 = vsub.s32 0, %v301_v60  ;;  %p492_p0 = scmp.ne.s32.totalorder %s386_s0, %s491_s10  ;;  %p496_p1 = scmp.lt.s32.totalorder %s386_s0, %s386_s0 }
   0xd   :  { %451 = vmatprep.mubr.msk.f32.mxu0 %vm517_vm2, %v518_v39  ;;  %p497_p2 = scmp.lt.s32.totalorder %s495_s11, %s491_s10 }
   0xe   :  { %173 = vperm.xlu0 %473, %v167_v11  }
   0xf   :  { %178 = vperm.xlu1 %474, %v168_v12   ;;  %p498_p3 = por %p497_p2, %p496_p1 }
  0x11   :  { %p499_p4 = pnand %p498_p3, %p492_p0 }
  0x12   :  { %183 = vperm.xlu0 %473, %v169_v13  }
  0x13   :  { %188 = vperm.xlu1 %474, %v170_v14  }
  0x16   :  { %297 = vperm.xlu0 %473, %v294_v15  }
  0x85   :  { %v41_v17 = vpop.permute.xlu0 %40 }
  0x86   :  { %v51_v18 = vpop.permute.xlu1 %50 }
  0x89   :  { %v46_v19 = vpop.permute.xlu0 %45 }
  0x8a   :  { %v56_v24 = vpop.permute.xlu1 %55 }
  0x8d   :  { %v174_v41 = vpop.permute.xlu0 %173 }
  0x8e   :  { %v179_v40 = vpop.permute.xlu1 %178 }
  0x91   :  { %v184_v48 = vpop.permute.xlu0 %183 }
  0x92   :  { %v189_v46 = vpop.permute.xlu1 %188 }
  0x95   :  { %v298_v62 = vpop.permute.xlu0 %297 }
  0x96   :  { %v303_v63 = vrot.slane %v298_v62, %v302_v61 }
  0xdb   :  { %v425_v20 = vpop.f32.mrb[0].mxu0 }
  0xdc   :  { %v146_v21 = vadd.f32 %v425_v20, %v46_v19  ;;  %v140_v22 = vpop.f32.mrb[1].mxu0 }
  0xdd   :  { %v141_v23 = vadd.f32 %v140_v22, %v41_v17 }
  0xde   :  { %475 = vtanh.f32 %v146_v21 }
  0xdf   :  { %477 = vtanh.f32 %v141_v23  ;;  %v428_v25 = vpop.f32.mrb[2].mxu0 }
  0xe0   :  { %v156_v26 = vadd.f32 %v428_v25, %v56_v24  ;;  %v150_v27 = vpop.f32.mrb[3].mxu0 }
  0xe1   :  { %v151_v28 = vadd.f32 %v150_v27, %v51_v18 }
  0xe2   :  { %479 = vtanh.f32 %v156_v26 }
  0xe3   :  { %481 = vtanh.f32 %v151_v28 }
  0xe8   :  { %v476_v29 = vpop.eup %475 }
  0xe9   :  { %v478_v30 = vpop.eup %477 }
  0xea   :  { %v454_v31 = vpack.c.bf16 %v476_v29, %v478_v30 }
  0xec   :  { %v480_v32 = vpop.eup %479  ;;  %455 = vmatprep.subr.bf16.mxu1 %v454_v31 }
  0xed   :  { %v482_v33 = vpop.eup %481  ;;  %457 = vmatpush3.bf16.msra.mxu1 %v454_v31 }
  0xee   :  { %v458_v34 = vpack.c.bf16 %v480_v32, %v482_v33 }
  0xf0   :  { %459 = vmatprep.subr.bf16.mxu1 %v458_v34 }
  0xf1   :  { %461 = vmatpush3.bf16.msra.mxu1 %v458_v34 }
  0xf4   :  { %438 = vmatmul.mubr.msk.f32.vlgmr.msra.gmra.mrb[0].mxu1 %vm191_vm1, %v164_v35 }
  0xf5   :  { %440 = vmatprep.mubr.msk.f32.mxu1 %vm191_vm1, %v165_v36 }
  0xf8   :  { %441 = vmatmul.mubr.msk.f32.gmra.mrb[2].mxu1 %vm191_vm1, %v166_v37 }
 0x1c7   :  { %v439_v42 = vpop.f32.mrb[0].mxu1 }
 0x1c8   :  { %v276_v43 = vadd.f32 %v439_v42, %v179_v40  ;;  %v270_v44 = vpop.f32.mrb[1].mxu1 }
 0x1c9   :  { %v271_v45 = vadd.f32 %v270_v44, %v174_v41 }
 0x1ca   :  { %483 = vtanh.f32 %v276_v43 }
 0x1cb   :  { %485 = vtanh.f32 %v271_v45  ;;  %v442_v47 = vpop.f32.mrb[2].mxu1 }
 0x1cc   :  { %v286_v49 = vadd.f32 %v442_v47, %v189_v46  ;;  %v280_v50 = vpop.f32.mrb[3].mxu1 }
 0x1cd   :  { %v281_v51 = vadd.f32 %v280_v50, %v184_v48 }
 0x1ce   :  { %487 = vtanh.f32 %v286_v49 }
 0x1cf   :  { %489 = vtanh.f32 %v281_v51 }
 0x1d4   :  { %v484_v52 = vpop.eup %483 }
 0x1d5   :  { %v486_v53 = vpop.eup %485 }
 0x1d6   :  { %v463_v54 = vpack.c.bf16 %v484_v52, %v486_v53 }
 0x1d8   :  { %v488_v55 = vpop.eup %487  ;;  %464 = vmatpush3.bf16.msra.mxu0 %v463_v54 }
 0x1d9   :  { %v490_v56 = vpop.eup %489  ;;  %465 = vmatprep.subr.bf16.mxu0 %v516_v38 }
 0x1da   :  { %v466_v57 = vpack.c.bf16 %v488_v55, %v490_v56 }
 0x1dc   :  { %467 = vmatpush3.bf16.msra.mxu0 %v466_v57 }
 0x1df   :  { %452 = vmatmul.mubr.msk.f32.vlgmr.msra.gmra.mrb[4].mxu0 %vm191_vm1, %v293_v58 }
 0x2b2   :  { %v373_v0 = vpop.f32.mrb[4].mxu0 }
 0x2b3   :  { %v374_v1 = vadd.f32 %v373_v0, %v303_v63  ;;  %v453_v2 = vpop.f32.mrb[5].mxu0 }
 0x2b5   :  { %378 = vst.msk [vmem:[#allocation3] sm:$0x1] %vm377_vm3, %v374_v1 }
 0x2b6   :  { %502 = shalt.err (!%p499_p4)
}
 0x2b7   :  { %s503_s13 = scalar_lea.hbm %s647_s7, 16 }
 0x2b8   :  { %p504_p5 = scmp.ne.s32.totalorder %s647_s7, %s503_s13  ;;  %p507_p6 = scmp.lt.u32.totalorder %s503_s13, %s647_s7 }
 0x2ba   :  { %p509_p7 = pnand %p507_p6, %p504_p5 }
 0x2bc   :  { %512 = shalt.err (!%p509_p7)
}
 0x2bd   :  { %388 = dma.vmem_to_hbm [thread:$0]  %s386_s0, 16, %s647_s7, [#allocation4]  }
 0x2be   :  { %513 = dma.done.wait [#allocation4], 16  }
 0x2bf   :  { %514 = vsyncadd [#allocation4], 4294967280 }
 0x2c0   :  { %392 = vsyncpa [#allocation4], 1 }

</bundles_post_ra>
